<compile_context>
chip_gen: v5e
topology: v5e:2x2
jax: 0.10.0
libtpu: 0.0.40
codegen_flags: <defaults>
</compile_context>

<pallas_src>
import functools

import jax
import jax.numpy as jnp
from jax.experimental import pallas as pl
from jax.experimental.pallas import tpu as pltpu


def self_attention_kernel(gamma_ref, x_ref, wv_ref, bv_ref, o_ref):
    """o = gamma * (x @ Wv + bv) + x   (exact forward of the PyTorch module)."""
    x = x_ref[...]                                        # (tb, D)  f32 row tile
    w = wv_ref[...]                                       # (D, D)   f32 or bf16
    # Value projection on the MXU; f32 accumulation regardless of input dtype.
    v = jnp.dot(x.astype(w.dtype), w, preferred_element_type=jnp.float32)
    v = v + bv_ref[...]                                   # bias add in f32
    gamma = gamma_ref[0]                                  # single SMEM scalar read (hoisted)
    o_ref[...] = (gamma * v + x).astype(o_ref.dtype)      # residual epilogue in f32


@functools.partial(jax.jit, static_argnames=("block_b", "use_bf16"))
def self_attention(x, wq, bq, wk, bk, wv, bv, gamma, *, block_b=256, use_bf16=False):
    # seq-length after .view is 1  =>  softmax over one logit == 1  =>  out == V.
    # Q/K parameters are accepted for interface fidelity but are provably dead compute.
    del wq, bq, wk, bk
    B, D = x.shape

    if use_bf16:                          # halve HBM weight traffic, feed the MXU bf16
        wv = wv.astype(jnp.bfloat16)

    tb = min(block_b, B)
    num_blocks = pl.cdiv(B, tb)
    Bp = num_blocks * tb
    if Bp != B:                           # pad batch up to a whole number of row tiles
        x_in = jnp.pad(x, ((0, Bp - B), (0, 0)))
    else:
        x_in = x

    # Per-step VMEM footprint: 2*(tb*D) [x dbl-buf] + 2*(tb*D) [o dbl-buf] + D*D + D words.
    # Tiny at demo sizes; for large D budget against 64 MiB (v7x) / 16 MiB default scoped
    # limit (v5e) and tile Wv's output (N) dimension (multiples of 256 on v7x, 128 on v5e)
    # once it no longer fits resident.
    out = pl.pallas_call(
        self_attention_kernel,
        out_shape=jax.ShapeDtypeStruct((Bp, D), x.dtype),
        grid=(num_blocks,),
        in_specs=[
            pl.BlockSpec(memory_space=pltpu.MemorySpace.SMEM),   # gamma (1,) scalar
            pl.BlockSpec((tb, D), lambda i: (i, 0)),             # x row tile (pipelined)
            pl.BlockSpec((D, D), lambda i: (0, 0)),              # Wv (resident every step)
            pl.BlockSpec((1, D), lambda i: (0, 0)),              # bv (resident every step)
        ],
        out_specs=pl.BlockSpec((tb, D), lambda i: (i, 0)),
        compiler_params=pltpu.CompilerParams(
            dimension_semantics=("parallel",),                   # shard batch across TCs
        ),
        input_output_aliases={1: 0},                             # residual update in place
    )(gamma, x_in, wv, bv.reshape(1, -1))

    return out[:B] if Bp != B else out


def self_attention_ref(x, wq, bq, wk, bk, wv, bv, gamma):
    """Pure-JAX reference mirroring the PyTorch forward exactly (incl. the dead softmax)."""
    B, D = x.shape
    qd = wq.shape[1]
    Q = (x @ wq + bq).reshape(B, 1, qd)
    K = (x @ wk + bk).reshape(B, 1, qd)
    V = (x @ wv + bv).reshape(B, 1, D)
    scores = jnp.einsum('bqd,bkd->bqk', Q, K) / (qd ** 0.5)
    attn = jax.nn.softmax(scores, axis=-1)
    out = jnp.einsum('bqk,bkd->bqd', attn, V).reshape(B, D)
    return gamma[0] * out + x


if __name__ == "__main__":
    B, D = 256, 128                  # in_dim = 128 -> query/key dim = 16 (dead on device)
    qd = D // 8

    key = jax.random.PRNGKey(0)
    kx, kwq, kbq, kwk, kbk, kwv, kbv = jax.random.split(key, 7)

    # Deterministic, PyTorch-Linear-style uniform(-1/sqrt(in), 1/sqrt(in)) init.
    bound = 1.0 / (D ** 0.5)
    x  = jax.random.normal(kx, (B, D), dtype=jnp.float32)
    wq = jax.random.uniform(kwq, (D, qd), jnp.float32, -bound, bound)
    bq = jax.random.uniform(kbq, (qd,),   jnp.float32, -bound, bound)
    wk = jax.random.uniform(kwk, (D, qd), jnp.float32, -bound, bound)
    bk = jax.random.uniform(kbk, (qd,),   jnp.float32, -bound, bound)
    wv = jax.random.uniform(kwv, (D, D),  jnp.float32, -bound, bound)
    bv = jax.random.uniform(kbv, (D,),    jnp.float32, -bound, bound)

    # gamma initialized to zeros exactly as in the PyTorch module, plus a nonzero value.
    for g in (0.0, 0.5):
        gamma = jnp.full((1,), g, dtype=jnp.float32)
        out = jax.block_until_ready(
            self_attention(x, wq, bq, wk, bk, wv, bv, gamma, block_b=128))
        ref = self_attention_ref(x, wq, bq, wk, bk, wv, bv, gamma)
        assert jnp.allclose(out, ref, atol=1e-4, rtol=1e-4), f"f32 mismatch (gamma={g})"

    # bf16-fed MXU path (v6e/v7x bandwidth optimization); f32 accumulate + f32 epilogue.
    gamma = jnp.full((1,), 0.5, dtype=jnp.float32)
    out_bf16 = jax.block_until_ready(
        self_attention(x, wq, bq, wk, bk, wv, bv, gamma, block_b=128, use_bf16=True))
    ref = self_attention_ref(x, wq, bq, wk, bk, wv, bv, gamma)
    assert jnp.allclose(out_bf16, ref, atol=5e-2, rtol=5e-2), "bf16 mismatch"

    # Batch not a multiple of the row tile -> exercises the padding path.
    B2 = 200
    x2 = jax.random.normal(jax.random.PRNGKey(1), (B2, D), dtype=jnp.float32)
    out2 = jax.block_until_ready(
        self_attention(x2, wq, bq, wk, bk, wv, bv, gamma, block_b=128))
    ref2 = self_attention_ref(x2, wq, bq, wk, bk, wv, bv, gamma)
    assert jnp.allclose(out2, ref2, atol=1e-4, rtol=1e-4), "padded-batch mismatch"

    print("KERNEL_OK")
</pallas_src>

<mosaic_0001>
module attributes {stable_mosaic.version = 11 : i64} {
  func.func @self_attention_kernel(%arg0: i32, %arg1: memref<1xf32, #tpu.memory_space<smem>>, %arg2: memref<128x128xf32, #tpu.memory_space<vmem>>, %arg3: memref<128x128xf32, #tpu.memory_space<vmem>>, %arg4: memref<1x128xf32, #tpu.memory_space<vmem>>, %arg5: memref<128x128xf32, #tpu.memory_space<vmem>>) attributes {dimension_semantics = [#tpu.dimension_semantics<parallel>], iteration_bounds = array<i64: 2>, scalar_prefetch = 0 : i64, scratch_operands = 0 : i64, tpu.core_type = #tpu.core_type<tc>, window_params = [{transform_indices = @transform_0, window_bounds = array<i64: 1>}, {transform_indices = @transform_1, window_bounds = array<i64: 128, 128>}, {pipeline_mode = #tpu.pipeline_mode<synchronous>, transform_indices = @transform_2, window_bounds = array<i64: 128, 128>}, {pipeline_mode = #tpu.pipeline_mode<synchronous>, transform_indices = @transform_3, window_bounds = array<i64: 1, 128>}, {transform_indices = @transform_4, window_bounds = array<i64: 128, 128>}]} {
    %c0 = arith.constant 0 : index
    %c0_0 = arith.constant 0 : index
    %0 = vector.load %arg2[%c0, %c0_0] : memref<128x128xf32, #tpu.memory_space<vmem>>, vector<128x128xf32>
    %c0_1 = arith.constant 0 : index
    %c0_2 = arith.constant 0 : index
    %1 = vector.load %arg3[%c0_1, %c0_2] : memref<128x128xf32, #tpu.memory_space<vmem>>, vector<128x128xf32>
    %cst = arith.constant dense<0.000000e+00> : vector<128x128xf32>
    %2 = tpu.matmul %0, %1, %cst {dimension_numbers = #tpu.dot_dimension_numbers<[1], [0], [0], [1], [0, 0, 1, 1], [], []>} : vector<128x128xf32>, vector<128x128xf32>, vector<128x128xf32> -> vector<128x128xf32>
    %c0_3 = arith.constant 0 : index
    %c0_4 = arith.constant 0 : index
    %3 = vector.load %arg4[%c0_3, %c0_4] : memref<1x128xf32, #tpu.memory_space<vmem>>, vector<1x128xf32>
    %4 = vector.broadcast %3 : vector<1x128xf32> to vector<128x128xf32>
    %5 = arith.addf %2, %4 : vector<128x128xf32>
    %c0_5 = arith.constant 0 : index
    %6 = memref.load %arg1[%c0_5] : memref<1xf32, #tpu.memory_space<smem>>
    %7 = vector.broadcast %6 : f32 to vector<128x128xf32>
    %8 = arith.mulf %7, %5 : vector<128x128xf32>
    %9 = arith.addf %8, %0 : vector<128x128xf32>
    %c0_6 = arith.constant 0 : index
    %c0_7 = arith.constant 0 : index
    %10 = vector.load %arg5[%c0_6, %c0_7] : memref<128x128xf32, #tpu.memory_space<vmem>>, vector<128x128xf32>
    tpu.vector_store %arg5[%c0_6, %c0_7], %9 {strides = array<i32>} : memref<128x128xf32, #tpu.memory_space<vmem>>, vector<128x128xf32>,
    return
  }
  func.func @transform_0(%arg0: i32) -> i32 {
    %c0_i32 = arith.constant 0 : i32
    %c0_i32_0 = arith.constant 0 : i32
    return %c0_i32 : i32
  }
  func.func @transform_1(%arg0: i32) -> (i32, i32) {
    %c0_i32 = arith.constant 0 : i32
    %c0_i32_0 = arith.constant 0 : i32
    return %arg0, %c0_i32 : i32, i32
  }
  func.func @transform_2(%arg0: i32) -> (i32, i32) {
    %c0_i32 = arith.constant 0 : i32
    %c0_i32_0 = arith.constant 0 : i32
    %c0_i32_1 = arith.constant 0 : i32
    return %c0_i32, %c0_i32_0 : i32, i32
  }
  func.func @transform_3(%arg0: i32) -> (i32, i32) {
    %c0_i32 = arith.constant 0 : i32
    %c0_i32_0 = arith.constant 0 : i32
    %c0_i32_1 = arith.constant 0 : i32
    return %c0_i32, %c0_i32_0 : i32, i32
  }
  func.func @transform_4(%arg0: i32) -> (i32, i32) {
    %c0_i32 = arith.constant 0 : i32
    %c0_i32_0 = arith.constant 0 : i32
    return %arg0, %c0_i32 : i32, i32
  }
}

</mosaic_0001>

<bundles_post_ra>
// kernel: self_attention.1
= control target key start
LH: loop header
LB: loop body
LE: loop exit
PB: predicated region body
PF: predicated region fallthrough
CT: control target
= control target key end

     0   :  { %s1001_s0 = inlined_call_operand.<no memory space> [shape: f32[1], index: 0, kind: input, shape index: {}]   ;;  %s1002_s1 = inlined_call_operand.hbm [shape: f32[256,128], index: 1, kind: input, shape index: {}, may-alias: {1,4}]   ;;  %s1003_s2 = inlined_call_operand.vmem [shape: f32[128,128], index: 2, kind: input, shape index: {}]   ;;  %s1004_s3 = inlined_call_operand.vmem [shape: f32[1,128], index: 3, kind: input, shape index: {}]   ;;  %s1005_s4 = inlined_call_operand.hbm [shape: f32[256,128], index: 4, kind: output, shape index: {}, may-alias: {1,4}]  }
   0x1   :  { %9 = sst [smem:[#allocation2]] %s1001_s0 }
   0x2   :  { %10 = vsyncpa [#allocation4], 0 }
   0x3   :  { %12 = vsyncpa [#allocation4 + $0x1], 0 }
   0x4   :  { %13 = vsyncpa [#allocation5], 0 }
   0x5   :  { %15 = vsyncpa [#allocation5 + $0x1], 0  ;;  %s706_s17 = smov 0   ;;  %s708_s18 = smov 0  }
   0x6   :  { %s710_s19 = smov 0   ;;  %s712_s20 = smov 0  }
   0x7 LB: > { %s727_s0 = sadd.s32 4294967295, %s672_s20   ;;  %s461_s21 = sadd.s32 4294967294, %s672_s20   ;;  %s672_s20 = sphi %s712_s20, %s1015_s20   ;;  %s668_s19 = sphi %s710_s19, %s1014_s19   ;;  %s664_s18 = sphi %s708_s18, %s1013_s18   ;;  %s660_s17 = sphi %s706_s17, %s1012_s17  }
   0x8   : > { %s731_s22 = sadd.s32 1, %s672_s20   ;;  %s49_s23 = sadd.s32 1, %s668_s19 }
   0x9   : > { %s46_s24 = ssub.s32 %s672_s20, %s731_s22  ;;  %p56_p0 = scmp.ne.s32.totalorder %s668_s19, %s664_s18 }
   0xa   : > { %p47_p1 = scmp.eq.s32.totalorder %s46_s24, 0  ;;  %p57_p2 = scmp.eq.s32.totalorder %s672_s20, 0 }
   0xb   : > { %p62_p3 = scmp.ne.s32.totalorder %s664_s18, %s660_s17  ;;  %p63_p4 = scmp.eq.s32.totalorder %s727_s0, 0 }
   0xc   : > { %s743_s25 = scalar_select %p47_p1, %s668_s19, %s49_s23  }
   0xd   : > { %p745_p5 = por %p57_p2, %p56_p0  ;;  %p749_p6 = por %p63_p4, %p62_p3 }
   0xe   : > { %p128_p7 = scmp.eq.s32.totalorder %s727_s0, 1  ;;  %p134_p8 = scmp.eq.s32.totalorder %s461_s21, 1 }
   0xf   : > { %p537_p10 = scmp.lt.s32.totalorder %s672_s20, 2  ;;  %s163_s30 = sand.u32 1, %s668_s19  }
  0x10   : > { %p756_p11 = por %p128_p7, %p56_p0  ;;  %p760_p12 = por %p134_p8, %p62_p3 }
  0x11   : > { %s475_s5 = sshll.u32 %s672_s20, 7  ;;  %s464_s6 = sshll.u32 %s163_s30, 7 }
  0x12   : > { %s172_s9 = scalar_lea.hbm %s1002_s1, %s475_s5  ;;  %s167_s11 = scalar_lea.vmem [#allocation3], %s464_s6 }
  0x13   : > { %s173_s10 = sshll.u32 %s172_s9, 4  ;;  %s175_s12 = sshll.u32 %s167_s11, 4  ;;  %s174_s10 = int_to_ptr.hbm [resolvable:$true] %s173_s10  ;;  %s176_s12 = int_to_ptr.vmem [resolvable:$true] %s175_s12 }
  0x14   : > { %p771_p13 = pnand %p537_p10, %p745_p5  ;;  %p467_p0 = scmp.ge.s32.totalorder %s672_s20, 1 }
  0x15   : > { %p183_p1 = scmp.lt.s32.totalorder %s672_s20, 3  ;;  %s164_s14 = scalar_lea.sflag [#allocation4], %s163_s30 }
  0x16   : > { %s576_s15 = sshra.s32 %s174_s10, 4  ;;  %p580_p3 = pneg %p771_p13  ;;  %s577_s15 = int_to_ptr.hbm [resolvable:$true] %s576_s15 }
  0x17   : > { %s578_s16 = scalar_lea.hbm %s577_s15, 128  ;;  %s583_s24 = scalar_lea.hbm %s1002_s1, 256 }
  0x18   : > { %p579_p2 = scmp.ne.s32.totalorder %s577_s15, %s578_s16  ;;  %p584_p5 = scmp.lt.s32.totalorder %s577_s15, %s1002_s1 }
  0x19   : > { %p585_p8 = scmp.lt.s32.totalorder %s583_s24, %s578_s16 }
  0x1a   : > { %p581_p4 = pnand %p580_p3, %p579_p2 }
  0x1b   : > { %p586_p10 = por %p585_p8, %p584_p5 }
  0x1c   : > { %p582_p7 = pneg %p581_p4 }
  0x1e   : > { %p587_p9 = pnand %p586_p10, %p582_p7 }
  0x20   : > { %590 = shalt.err (!%p587_p9)
}
  0x21   : > { %s674_s30 = smov 128   ;;  %s675_s6 = smov 8  }
  0x22   : > { %532 = dma.hbm_to_vmem [thread:$0]  (!%p771_p13), %s174_s10, 2048, %s176_s12, %s164_s14, %s674_s30, %s674_s30, %s675_s6  }
  0x23   : > { %p184_p2 = pnand %p467_p0, %p183_p1 }
  0x24   : > { %s792_s7 = sand.u32 (!%p184_p2), 1, %s664_s18  }
  0x25   : > { %187 = sbr.rel (%p184_p2) target bundleno = 242 (0xf2), region = 36  ;;  %s468_s8 = sshll.u32 (!%p184_p2), %s792_s7, 7 }
  0x26   : > { %s190_s9 = scalar_lea.sflag (!%p184_p2), [#allocation4], %s792_s7  ;;  %s798_s11 = scalar_lea.vmem (!%p184_p2), [#allocation3], %s468_s8 }
  0x2a   : > { %651 = dma.done.wait (%p749_p6), %s190_s9, 2048  }
  0x2b   : > { %653 = vsyncadd (%p749_p6), %s190_s9, 4294965248  ;;  %v252_v0 = vld [vmem:[%s1003_s2 + $0x78] sm:$0xff]  ;;  %v251_v1 = vld [vmem:[%s1003_s2 + $0x70] sm:$0xff]  ;;  %s322_s13 = sld [smem:[#allocation2]]  ;;  %s373_s24 = scalar_lea.sflag [#allocation5], %s792_s7 }
  0x2c   : > { %478 = vmatpush.msra.mxu2 %v252_v0  ;;  %479 = vmatpush.msra.mxu3 %v252_v0  ;;  %v250_v2 = vld [vmem:[%s1003_s2 + $0x68] sm:$0xff]  ;;  %v249_v3 = vld [vmem:[%s1003_s2 + $0x60] sm:$0xff]  ;;  %v248_v4 = vld [vmem:[%s1003_s2 + $0x58] sm:$0xff]  ;;  %s626_s9 = scalar_lea.hbm %s1005_s4, 256 }
  0x2d   : > { %257 = vmatpush.msra.mxu0 %v252_v0  ;;  %477 = vmatpush.msra.mxu1 %v252_v0  ;;  %v247_v5 = vld [vmem:[%s1003_s2 + $0x50] sm:$0xff]  ;;  %v246_v6 = vld [vmem:[%s1003_s2 + $0x48] sm:$0xff]  ;;  %v245_v7 = vld [vmem:[%s1003_s2 + $0x40] sm:$0xff] }
  0x2e   : > { %481 = vmatpush.msra.mxu2 %v251_v1  ;;  %482 = vmatpush.msra.mxu3 %v251_v1  ;;  %v244_v8 = vld [vmem:[%s1003_s2 + $0x38] sm:$0xff]  ;;  %v243_v9 = vld [vmem:[%s1003_s2 + $0x30] sm:$0xff]  ;;  %v242_v10 = vld [vmem:[%s1003_s2 + $0x28] sm:$0xff] }
  0x2f   : > { %258 = vmatpush.msra.mxu0 %v251_v1  ;;  %480 = vmatpush.msra.mxu1 %v251_v1  ;;  %v241_v11 = vld [vmem:[%s1003_s2 + $0x20] sm:$0xff]  ;;  %v240_v12 = vld [vmem:[%s1003_s2 + $0x18] sm:$0xff]  ;;  %v239_v13 = vld [vmem:[%s1003_s2 + $0x10] sm:$0xff] }
  0x30   : > { %484 = vmatpush.msra.mxu2 %v250_v2  ;;  %485 = vmatpush.msra.mxu3 %v250_v2  ;;  %v238_v14 = vld [vmem:[%s1003_s2 + $0x8] sm:$0xff]  ;;  %v237_v15 = vld [vmem:[%s1003_s2] sm:$0xff]  ;;  %v867_v24 = vld [vmem:[%s798_s11 + $0x50] sm:$0xff] }
  0x31   : > { %259 = vmatpush.msra.mxu0 %v250_v2  ;;  %483 = vmatpush.msra.mxu1 %v250_v2  ;;  %v229_v16 = vld [vmem:[%s798_s11 + $0x40] sm:$0xff]  ;;  %v857_v20 = vld [vmem:[%s798_s11 + $0x48] sm:$0xff]  ;;  %v870_v25 = vld [vmem:[%s798_s11 + $0x70] sm:$0xff]  ;;  %v903_v34 = vstv %s322_s13 }
  0x32   : > { %487 = vmatpush.msra.mxu2 %v249_v3  ;;  %488 = vmatpush.msra.mxu3 %v249_v3  ;;  %v233_v17 = vld [vmem:[%s798_s11 + $0x60] sm:$0xff]  ;;  %v860_v21 = vld [vmem:[%s798_s11 + $0x68] sm:$0xff]  ;;  %v873_v26 = vld [vmem:[%s798_s11 + $0x10] sm:$0xff] }
  0x33   : > { %260 = vmatpush.msra.mxu0 %v249_v3  ;;  %486 = vmatpush.msra.mxu1 %v249_v3  ;;  %v221_v18 = vld [vmem:[%s798_s11] sm:$0xff]  ;;  %v222_v22 = vld [vmem:[%s798_s11 + $0x8] sm:$0xff]  ;;  %v876_v27 = vld [vmem:[%s798_s11 + $0x30] sm:$0xff] }
  0x34   : > { %490 = vmatpush.msra.mxu2 %v248_v4  ;;  %491 = vmatpush.msra.mxu3 %v248_v4  ;;  %v225_v19 = vld [vmem:[%s798_s11 + $0x20] sm:$0xff]  ;;  %v226_v23 = vld [vmem:[%s798_s11 + $0x28] sm:$0xff]  ;;  %v883_v28 = vld [vmem:[%s798_s11 + $0x58] sm:$0xff] }
  0x35   : > { %261 = vmatpush.msra.mxu0 %v248_v4  ;;  %489 = vmatpush.msra.mxu1 %v248_v4  ;;  %v886_v29 = vld [vmem:[%s798_s11 + $0x78] sm:$0xff]  ;;  %v901_v32 = vld [vmem:[%s1004_s3] ss:$0 sm:$0xff] }
  0x36   : > { %493 = vmatpush.msra.mxu2 %v247_v5  ;;  %494 = vmatpush.msra.mxu3 %v247_v5  ;;  %v889_v30 = vld [vmem:[%s798_s11 + $0x18] sm:$0xff] }
  0x37   : > { %262 = vmatpush.msra.mxu0 %v247_v5  ;;  %492 = vmatpush.msra.mxu1 %v247_v5  ;;  %v892_v31 = vld [vmem:[%s798_s11 + $0x38] sm:$0xff]  ;;  %s913_s11 = scalar_lea.vmem [#allocation6], %s468_s8  ;;  %s476_s8 = sshll.u32 %s727_s0, 7 }
  0x38   : > { %496 = vmatpush.msra.mxu2 %v246_v6  ;;  %497 = vmatpush.msra.mxu3 %v246_v6  ;;  %s384_s0 = scalar_lea.hbm %s1005_s4, %s476_s8  ;;  %s385_s21 = sshll.u32 %s913_s11, 4  ;;  %s386_s21 = int_to_ptr.vmem [resolvable:$true] %s385_s21 }
  0x39   : > { %263 = vmatpush.msra.mxu0 %v246_v6  ;;  %495 = vmatpush.msra.mxu1 %v246_v6  ;;  %s387_s23 = sshll.u32 %s384_s0, 4  ;;  %s388_s23 = int_to_ptr.hbm [resolvable:$true] %s387_s23 }
  0x3a   : > { %499 = vmatpush.msra.mxu2 %v245_v7  ;;  %500 = vmatpush.msra.mxu3 %v245_v7  ;;  %s620_s26 = sshra.s32 %s388_s23, 4  ;;  %s621_s26 = int_to_ptr.hbm [resolvable:$true] %s620_s26 }
  0x3b   : > { %264 = vmatpush.msra.mxu0 %v245_v7  ;;  %498 = vmatpush.msra.mxu1 %v245_v7  ;;  %s622_s5 = scalar_lea.hbm %s621_s26, 128  ;;  %p627_p0 = scmp.lt.s32.totalorder %s621_s26, %s1005_s4 }
  0x3c   : > { %502 = vmatpush.msra.mxu2 %v244_v8  ;;  %503 = vmatpush.msra.mxu3 %v244_v8  ;;  %p623_p6 = scmp.ne.s32.totalorder %s621_s26, %s622_s5  ;;  %p628_p1 = scmp.lt.s32.totalorder %s626_s9, %s622_s5 }
  0x3d   : > { %265 = vmatpush.msra.mxu0 %v244_v8  ;;  %501 = vmatpush.msra.mxu1 %v244_v8 }
  0x3e   : > { %505 = vmatpush.msra.mxu2 %v243_v9  ;;  %506 = vmatpush.msra.mxu3 %v243_v9  ;;  %p624_p9 = pnand %p623_p6, %p756_p11  ;;  %p629_p3 = por %p628_p1, %p627_p0 }
  0x3f   : > { %266 = vmatpush.msra.mxu0 %v243_v9  ;;  %504 = vmatpush.msra.mxu1 %v243_v9 }
  0x40   : > { %508 = vmatpush.msra.mxu2 %v242_v10  ;;  %509 = vmatpush.msra.mxu3 %v242_v10  ;;  %p625_p13 = pneg %p624_p9 }
  0x41   : > { %267 = vmatpush.msra.mxu0 %v242_v10  ;;  %507 = vmatpush.msra.mxu1 %v242_v10 }
  0x42   : > { %511 = vmatpush.msra.mxu2 %v241_v11  ;;  %512 = vmatpush.msra.mxu3 %v241_v11  ;;  %p630_p4 = pnand %p629_p3, %p625_p13 }
  0x43   : > { %268 = vmatpush.msra.mxu0 %v241_v11  ;;  %510 = vmatpush.msra.mxu1 %v241_v11 }
  0x44   : > { %514 = vmatpush.msra.mxu2 %v240_v12  ;;  %515 = vmatpush.msra.mxu3 %v240_v12 }
  0x45   : > { %269 = vmatpush.msra.mxu0 %v240_v12  ;;  %513 = vmatpush.msra.mxu1 %v240_v12 }
  0x46   : > { %517 = vmatpush.msra.mxu2 %v239_v13  ;;  %518 = vmatpush.msra.mxu3 %v239_v13 }
  0x47   : > { %270 = vmatpush.msra.mxu0 %v239_v13  ;;  %516 = vmatpush.msra.mxu1 %v239_v13 }
  0x48   : > { %520 = vmatpush.msra.mxu2 %v238_v14  ;;  %521 = vmatpush.msra.mxu3 %v238_v14 }
  0x49   : > { %271 = vmatpush.msra.mxu0 %v238_v14  ;;  %519 = vmatpush.msra.mxu1 %v238_v14 }
  0x4a   : > { %523 = vmatpush.msra.mxu2 %v237_v15  ;;  %524 = vmatpush.msra.mxu3 %v237_v15 }
  0x4b   : > { %297 = vmatmul.f32.vlgmr.msra.gmra.mxu2 %v229_v16  ;;  %309 = vmatmul.f32.vlgmr.msra.gmra.mxu3 %v233_v17 }
  0x4c   : > { %272 = vmatpush.msra.mxu0 %v237_v15  ;;  %522 = vmatpush.msra.mxu1 %v237_v15 }
  0x4d   : > { %273 = vmatmul.f32.vlgmr.msra.gmra.mxu0 %v221_v18  ;;  %285 = vmatmul.f32.vlgmr.msra.gmra.mxu1 %v225_v19 }
  0x53   : > { %300 = vmatmul.f32.gmra.mxu2 %v857_v20  ;;  %312 = vmatmul.f32.gmra.mxu3 %v860_v21 }
  0x55   : > { %276 = vmatmul.f32.gmra.mxu0 %v222_v22  ;;  %288 = vmatmul.f32.gmra.mxu1 %v226_v23 }
  0x5b   : > { %303 = vmatmul.f32.gmra.mxu2 %v867_v24  ;;  %315 = vmatmul.f32.gmra.mxu3 %v870_v25 }
  0x5d   : > { %279 = vmatmul.f32.gmra.mxu0 %v873_v26  ;;  %291 = vmatmul.f32.gmra.mxu1 %v876_v27 }
  0x63   : > { %306 = vmatmul.f32.gmra.mxu2 %v883_v28  ;;  %318 = vmatmul.f32.gmra.mxu3 %v886_v29 }
  0x65   : > { %282 = vmatmul.f32.gmra.mxu0 %v889_v30  ;;  %294 = vmatmul.f32.gmra.mxu1 %v892_v31 }
  0xca   : > { %v274_v33 = vpop.f32.mrf.mxu0  ;;  %v286_v35 = vpop.f32.mrf.mxu1 }
  0xcb   : > { %v275_v36 = vadd.f32 %v901_v32, %v274_v33  ;;  %v287_v37 = vadd.f32 %v901_v32, %v286_v35 }
  0xcd   : > { %v324_v38 = vmul.f32 %v903_v34, %v275_v36  ;;  %v328_v39 = vmul.f32 %v903_v34, %v287_v37 }
  0xce   : > { %v298_v40 = vpop.f32.mrf.mxu2  ;;  %v310_v41 = vpop.f32.mrf.mxu3 }
  0xcf   : > { %v340_v42 = vadd.f32 %v324_v38, %v221_v18  ;;  %v344_v43 = vadd.f32 %v328_v39, %v225_v19  ;;  %v299_v44 = vadd.f32 %v901_v32, %v298_v40  ;;  %v311_v45 = vadd.f32 %v901_v32, %v310_v41 }
  0xd1   : > { %356 = vst [vmem:[%s913_s11] sm:$0xff] %v340_v42  ;;  %v332_v46 = vmul.f32 %v903_v34, %v299_v44  ;;  %v336_v47 = vmul.f32 %v903_v34, %v311_v45 }
  0xd2   : > { %360 = vst [vmem:[%s913_s11 + $0x20] sm:$0xff] %v344_v43  ;;  %v277_v48 = vpop.f32.mrf.mxu0  ;;  %v289_v49 = vpop.f32.mrf.mxu1 }
  0xd3   : > { %v348_v50 = vadd.f32 %v332_v46, %v229_v16  ;;  %v352_v51 = vadd.f32 %v336_v47, %v233_v17  ;;  %v278_v52 = vadd.f32 %v901_v32, %v277_v48  ;;  %v290_v53 = vadd.f32 %v901_v32, %v289_v49 }
  0xd5   : > { %364 = vst [vmem:[%s913_s11 + $0x40] sm:$0xff] %v348_v50  ;;  %v325_v54 = vmul.f32 %v903_v34, %v278_v52  ;;  %v329_v55 = vmul.f32 %v903_v34, %v290_v53 }
  0xd6   : > { %368 = vst [vmem:[%s913_s11 + $0x60] sm:$0xff] %v352_v51  ;;  %v301_v56 = vpop.f32.mrf.mxu2  ;;  %v313_v57 = vpop.f32.mrf.mxu3 }
  0xd7   : > { %v341_v58 = vadd.f32 %v325_v54, %v222_v22  ;;  %v345_v59 = vadd.f32 %v329_v55, %v226_v23  ;;  %v302_v60 = vadd.f32 %v901_v32, %v301_v56  ;;  %v314_v61 = vadd.f32 %v901_v32, %v313_v57 }
  0xd9   : > { %357 = vst [vmem:[%s913_s11 + $0x8] sm:$0xff] %v341_v58  ;;  %v333_v62 = vmul.f32 %v903_v34, %v302_v60  ;;  %v337_v63 = vmul.f32 %v903_v34, %v314_v61 }
  0xda   : > { %361 = vst [vmem:[%s913_s11 + $0x28] sm:$0xff] %v345_v59  ;;  %v280_v0 = vpop.f32.mrf.mxu0  ;;  %v292_v1 = vpop.f32.mrf.mxu1 }
  0xdb   : > { %v349_v2 = vadd.f32 %v333_v62, %v857_v20  ;;  %v353_v3 = vadd.f32 %v337_v63, %v860_v21  ;;  %v281_v4 = vadd.f32 %v901_v32, %v280_v0  ;;  %v293_v5 = vadd.f32 %v901_v32, %v292_v1 }
  0xdd   : > { %365 = vst [vmem:[%s913_s11 + $0x48] sm:$0xff] %v349_v2  ;;  %v326_v6 = vmul.f32 %v903_v34, %v281_v4  ;;  %v330_v7 = vmul.f32 %v903_v34, %v293_v5 }
  0xde   : > { %369 = vst [vmem:[%s913_s11 + $0x68] sm:$0xff] %v353_v3  ;;  %v304_v8 = vpop.f32.mrf.mxu2  ;;  %v316_v9 = vpop.f32.mrf.mxu3 }
  0xdf   : > { %v342_v10 = vadd.f32 %v326_v6, %v873_v26  ;;  %v346_v11 = vadd.f32 %v330_v7, %v876_v27  ;;  %v305_v12 = vadd.f32 %v901_v32, %v304_v8  ;;  %v317_v13 = vadd.f32 %v901_v32, %v316_v9 }
  0xe1   : > { %358 = vst [vmem:[%s913_s11 + $0x10] sm:$0xff] %v342_v10  ;;  %v334_v14 = vmul.f32 %v903_v34, %v305_v12  ;;  %v338_v15 = vmul.f32 %v903_v34, %v317_v13 }
  0xe2   : > { %362 = vst [vmem:[%s913_s11 + $0x30] sm:$0xff] %v346_v11  ;;  %v283_v16 = vpop.f32.mrf.mxu0  ;;  %v295_v17 = vpop.f32.mrf.mxu1 }
  0xe3   : > { %v350_v18 = vadd.f32 %v334_v14, %v867_v24  ;;  %v354_v19 = vadd.f32 %v338_v15, %v870_v25  ;;  %v284_v20 = vadd.f32 %v901_v32, %v283_v16  ;;  %v296_v21 = vadd.f32 %v901_v32, %v295_v17 }
  0xe5   : > { %366 = vst [vmem:[%s913_s11 + $0x50] sm:$0xff] %v350_v18  ;;  %v327_v22 = vmul.f32 %v903_v34, %v284_v20  ;;  %v331_v23 = vmul.f32 %v903_v34, %v296_v21 }
  0xe6   : > { %370 = vst [vmem:[%s913_s11 + $0x70] sm:$0xff] %v354_v19  ;;  %v307_v26 = vpop.f32.mrf.mxu2  ;;  %v319_v24 = vpop.f32.mrf.mxu3 }
  0xe7   : > { %v343_v25 = vadd.f32 %v327_v22, %v889_v30  ;;  %v347_v27 = vadd.f32 %v331_v23, %v892_v31  ;;  %v308_v33 = vadd.f32 %v901_v32, %v307_v26  ;;  %v320_v35 = vadd.f32 %v901_v32, %v319_v24 }
  0xe9   : > { %359 = vst [vmem:[%s913_s11 + $0x18] sm:$0xff] %v343_v25  ;;  %v335_v36 = vmul.f32 %v903_v34, %v308_v33  ;;  %v339_v37 = vmul.f32 %v903_v34, %v320_v35 }
  0xea   : > { %363 = vst [vmem:[%s913_s11 + $0x38] sm:$0xff] %v347_v27 }
  0xeb   : > { %v351_v38 = vadd.f32 %v335_v36, %v883_v28  ;;  %v355_v30 = vadd.f32 %v339_v37, %v886_v29 }
  0xed   : > { %367 = vst [vmem:[%s913_s11 + $0x58] sm:$0xff] %v351_v38 }
  0xee   : > { %371 = vst [vmem:[%s913_s11 + $0x78] sm:$0xff] %v355_v30 }
  0xef   : > { %633 = shalt.err (!%p630_p4)
}
  0xf0   : > { %s676_s7 = smov 128   ;;  %s677_s13 = smov 8  }
  0xf1   : > { %527 = dma.vmem_to_hbm [thread:$0]  (%p756_p11), %s386_s21, 2048, %s388_s23, %s373_s24, %s676_s7, %s676_s7, %s677_s13  }
  0xf2 PF: > { %s402_s14 = sand.u32 1, %s660_s17   ;;  %p1011_p7 = scmp.ge.s32.totalorder %s672_s20, 2 }
  0xf3   : > { %s403_s15 = scalar_lea.sflag [#allocation5], %s402_s14 }
  0xf4   : > { %p534_p5 = pnand %p1011_p7, %p760_p12 }
  0xf6   : > { %p535_p8 = pneg %p534_p5 }
  0xf8   : > { %655 = dma.done.wait (%p535_p8), %s403_s15, 2048  }
  0xf9   : > { %657 = vsyncadd (%p535_p8), %s403_s15, 4294965248  ;;  %p18_p10 = scmp.ge.s32.totalorder %s731_s22, 4   ;;  %s1012_s17 = smov %s664_s18 }
  0xfa   : > { %s1013_s18 = smov %s668_s19  ;;  %s1014_s19 = smov %s743_s25 }
  0xfb   : > { %s1015_s20 = smov %s731_s22  ;;  %20 = sbr.rel (!%p18_p10) target bundleno = 7 (0x7), region = 81 }
 0x100   :  { %409 = vsyncpa [#allocation4], 1 }
 0x101   :  { %411 = vsyncpa [#allocation4 + $0x1], 1 }
 0x102   :  { %412 = vsyncpa [#allocation5], 1 }
 0x103   :  { %414 = vsyncpa [#allocation5 + $0x1], 1 }

</bundles_post_ra>
